<compile_context>
chip_gen: v5e
topology: v5e:2x2
jax: 0.10.0
libtpu: 0.0.40
codegen_flags: <defaults>
</compile_context>

<pallas_src>
import functools

import jax
import jax.numpy as jnp
from jax.experimental import pallas as pl
from jax.experimental.pallas import tpu as pltpu

HIDDEN = 8
_HEAD_SIZE = 4 * HIDDEN + 1  # w1 (2*8) + b1 (8) + w2 (8) + b2 (1) = 33 floats per head


def two_heads_kernel(params_ref, x_ref, out_ref):
    """params_ref: SMEM f32[66]; x_ref: VMEM [3, T]; out_ref: VMEM [1, T]."""
    p = x_ref[0:1, :]   # [1, T]  lane-dense
    s = x_ref[1:2, :]   # [1, T]
    u = x_ref[2:3, :]   # [1, T]

    def head(base):
        # Output-layer bias, broadcast over all lanes.
        o = jnp.zeros_like(p) + params_ref[base + 4 * HIDDEN]
        # 8 hidden units, each a broadcast scalar*vector FMA on the VPU.
        for j in range(HIDDEN):
            w_p = params_ref[base + j]                 # W1[j, 0]
            w_s = params_ref[base + HIDDEN + j]        # W1[j, 1]
            b1 = params_ref[base + 2 * HIDDEN + j]     # b1[j]
            w2 = params_ref[base + 3 * HIDDEN + j]     # W2[0, j]
            h = jnp.maximum(w_p * p + w_s * s + b1, 0.0)   # Linear(2->8) unit j + ReLU
            o = o + w2 * h                                  # Linear(8->1) contribution
        return jnp.tanh(o)                                  # EUP

    pos = head(0)
    neg = head(_HEAD_SIZE)
    # torch.where((x[:, 2] == 4).view(-1, 1), pos, neg); float equality mirrors PyTorch.
    out_ref[...] = jnp.where(u == 4.0, pos, neg)


def init_linear_params(key, fan_in, fan_out):
    """Deterministic init mimicking nn.Linear default (uniform +-1/sqrt(fan_in)).
    Returns W as [in, out] (pre-transposed for x @ W) and b as [1, out]."""
    kw, kb = jax.random.split(key)
    bound = 1.0 / jnp.sqrt(jnp.float32(fan_in))
    w = jax.random.uniform(kw, (fan_in, fan_out), jnp.float32, -bound, bound)
    b = jax.random.uniform(kb, (1, fan_out), jnp.float32, -bound, bound)
    return w, b


def _pack_head(w1, b1, w2, b2):
    """w1: [2, 8] ([in, out]), b1: [1, 8], w2: [8, 1], b2: [1, 1] -> f32[33]."""
    return jnp.concatenate([
        w1[0, :].reshape(-1),   # weights on p, one per hidden unit
        w1[1, :].reshape(-1),   # weights on s
        jnp.ravel(b1),
        jnp.ravel(w2),
        jnp.ravel(b2),
    ]).astype(jnp.float32)


def pack_params(pw1, pb1, pw2, pb2, nw1, nb1, nw2, nb2):
    """Pack both heads into one flat f32[66] array for SMEM."""
    return jnp.concatenate([_pack_head(pw1, pb1, pw2, pb2),
                            _pack_head(nw1, nb1, nw2, nb2)])


@functools.partial(jax.jit, static_argnames=("block_n",))
def two_heads_forward(x, packed_params, *, block_n=32768):
    """x: [N, 3] float32, packed_params: f32[66]  ->  [N, 1] float32."""
    n = x.shape[0]
    # Lane-dense tile width: a multiple of 128, capped at block_n.
    bt = min(block_n, max(128, pl.cdiv(n, 128) * 128))
    n_pad = pl.cdiv(n, bt) * bt

    x_t = x.T                                        # [3, N]: N on the lane axis
    if n_pad != n:
        x_t = jnp.pad(x_t, ((0, 0), (0, n_pad - n)))

    out = pl.pallas_call(
        two_heads_kernel,
        out_shape=jax.ShapeDtypeStruct((1, n_pad), jnp.float32),
        grid_spec=pltpu.PrefetchScalarGridSpec(
            num_scalar_prefetch=0,
            grid=(n_pad // bt,),
            in_specs=[
                pl.BlockSpec(memory_space=pltpu.MemorySpace.SMEM),  # packed weights
                pl.BlockSpec((3, bt), lambda i: (0, i)),            # x tile, lane-dense
            ],
            out_specs=pl.BlockSpec((1, bt), lambda i: (0, i)),
        ),
        compiler_params=pltpu.CompilerParams(
            dimension_semantics=("parallel",)),   # megacore sharding on v7x
    )(packed_params, x_t)

    return out[0, :n].reshape(n, 1)


def two_heads_reference(x, params):
    """Pure-JAX reference for sanity checking."""
    (pw1, pb1, pw2, pb2, nw1, nb1, nw2, nb2) = params
    f = x[:, :2]

    def head(w1, b1, w2, b2):
        h = jnp.maximum(f @ w1 + b1, 0.0)
        return jnp.tanh(h @ w2 + b2)

    pos = head(pw1, pb1, pw2, pb2)
    neg = head(nw1, nb1, nw2, nb2)
    return jnp.where(x[:, 2:3] == 4.0, pos, neg)


if __name__ == "__main__":
    key = jax.random.PRNGKey(0)
    (k_x, k_p1, k_p2, k_n1, k_n2, k_flag, k_x2, k_flag2) = jax.random.split(key, 8)

    # Deterministic parameter init (shapes from the module's __init__).
    pw1, pb1 = init_linear_params(k_p1, 2, 8)   # pos_head Linear(2, 8)
    pw2, pb2 = init_linear_params(k_p2, 8, 1)   # pos_head Linear(8, 1)
    nw1, nb1 = init_linear_params(k_n1, 2, 8)   # neg_head Linear(2, 8)
    nw2, nb2 = init_linear_params(k_n2, 8, 1)   # neg_head Linear(8, 1)
    raw_params = (pw1, pb1, pw2, pb2, nw1, nb1, nw2, nb2)
    packed = pack_params(*raw_params)

    # Small example input [N, 3]: columns (p, s, u); u in {4, -4} so both
    # branches of the select are exercised.
    N = 8
    ps = jax.random.normal(k_x, (N, 2), jnp.float32)
    u = jnp.where(jax.random.bernoulli(k_flag, 0.5, (N, 1)), 4.0, -4.0)
    x = jnp.concatenate([ps, u], axis=1)

    out = jax.block_until_ready(two_heads_forward(x, packed))
    ref = two_heads_reference(x, raw_params)
    assert out.shape == (N, 1)
    assert jnp.allclose(out, ref, atol=1e-5, rtol=1e-5)

    # Multi-tile case: exercises the 1-D grid, lane padding, and the parallel axis.
    N2 = 1000
    ps2 = jax.random.normal(k_x2, (N2, 2), jnp.float32)
    u2 = jnp.where(jax.random.bernoulli(k_flag2, 0.5, (N2, 1)), 4.0, -4.0)
    x2 = jnp.concatenate([ps2, u2], axis=1)

    out2 = jax.block_until_ready(two_heads_forward(x2, packed, block_n=256))
    ref2 = two_heads_reference(x2, raw_params)
    assert out2.shape == (N2, 1)
    assert jnp.allclose(out2, ref2, atol=1e-5, rtol=1e-5)

    print("KERNEL_OK")
</pallas_src>

<mosaic_0001>
module attributes {stable_mosaic.version = 11 : i64} {
  func.func @two_heads_kernel(%arg0: i32, %arg1: memref<66xf32, #tpu.memory_space<smem>>, %arg2: memref<3x128xf32, #tpu.memory_space<vmem>>, %arg3: memref<1x128xf32, #tpu.memory_space<vmem>>) attributes {dimension_semantics = [#tpu.dimension_semantics<parallel>], iteration_bounds = array<i64: 1>, scalar_prefetch = 0 : i64, scratch_operands = 0 : i64, tpu.core_type = #tpu.core_type<tc>, window_params = [{transform_indices = @transform_0, window_bounds = array<i64: 66>}, {transform_indices = @transform_1, window_bounds = array<i64: 3, 128>}, {transform_indices = @transform_2, window_bounds = array<i64: 1, 128>}]} {
    %c0 = arith.constant 0 : index
    %c0_0 = arith.constant 0 : index
    %0 = vector.load %arg2[%c0, %c0_0] : memref<3x128xf32, #tpu.memory_space<vmem>>, vector<1x128xf32>
    %c1 = arith.constant 1 : index
    %c0_1 = arith.constant 0 : index
    %1 = vector.load %arg2[%c1, %c0_1] : memref<3x128xf32, #tpu.memory_space<vmem>>, vector<1x128xf32>
    %c2 = arith.constant 2 : index
    %c0_2 = arith.constant 0 : index
    %2 = vector.load %arg2[%c2, %c0_2] : memref<3x128xf32, #tpu.memory_space<vmem>>, vector<1x128xf32>
    %cst = arith.constant 0.000000e+00 : f32
    %3 = vector.broadcast %cst : f32 to vector<1x128xf32>
    %c32 = arith.constant 32 : index
    %4 = memref.load %arg1[%c32] : memref<66xf32, #tpu.memory_space<smem>>
    %5 = vector.broadcast %4 : f32 to vector<1x128xf32>
    %6 = arith.addf %3, %5 : vector<1x128xf32>
    %c0_3 = arith.constant 0 : index
    %7 = memref.load %arg1[%c0_3] : memref<66xf32, #tpu.memory_space<smem>>
    %c8 = arith.constant 8 : index
    %8 = memref.load %arg1[%c8] : memref<66xf32, #tpu.memory_space<smem>>
    %c16 = arith.constant 16 : index
    %9 = memref.load %arg1[%c16] : memref<66xf32, #tpu.memory_space<smem>>
    %c24 = arith.constant 24 : index
    %10 = memref.load %arg1[%c24] : memref<66xf32, #tpu.memory_space<smem>>
    %11 = vector.broadcast %7 : f32 to vector<1x128xf32>
    %12 = arith.mulf %11, %0 : vector<1x128xf32>
    %13 = vector.broadcast %8 : f32 to vector<1x128xf32>
    %14 = arith.mulf %13, %1 : vector<1x128xf32>
    %15 = arith.addf %12, %14 : vector<1x128xf32>
    %16 = vector.broadcast %9 : f32 to vector<1x128xf32>
    %17 = arith.addf %15, %16 : vector<1x128xf32>
    %cst_4 = arith.constant 0.000000e+00 : f32
    %18 = vector.broadcast %cst_4 : f32 to vector<1x128xf32>
    %19 = arith.maximumf %17, %18 : vector<1x128xf32>
    %20 = vector.broadcast %10 : f32 to vector<1x128xf32>
    %21 = arith.mulf %20, %19 : vector<1x128xf32>
    %22 = arith.addf %6, %21 : vector<1x128xf32>
    %c1_5 = arith.constant 1 : index
    %23 = memref.load %arg1[%c1_5] : memref<66xf32, #tpu.memory_space<smem>>
    %c9 = arith.constant 9 : index
    %24 = memref.load %arg1[%c9] : memref<66xf32, #tpu.memory_space<smem>>
    %c17 = arith.constant 17 : index
    %25 = memref.load %arg1[%c17] : memref<66xf32, #tpu.memory_space<smem>>
    %c25 = arith.constant 25 : index
    %26 = memref.load %arg1[%c25] : memref<66xf32, #tpu.memory_space<smem>>
    %27 = vector.broadcast %23 : f32 to vector<1x128xf32>
    %28 = arith.mulf %27, %0 : vector<1x128xf32>
    %29 = vector.broadcast %24 : f32 to vector<1x128xf32>
    %30 = arith.mulf %29, %1 : vector<1x128xf32>
    %31 = arith.addf %28, %30 : vector<1x128xf32>
    %32 = vector.broadcast %25 : f32 to vector<1x128xf32>
    %33 = arith.addf %31, %32 : vector<1x128xf32>
    %cst_6 = arith.constant 0.000000e+00 : f32
    %34 = vector.broadcast %cst_6 : f32 to vector<1x128xf32>
    %35 = arith.maximumf %33, %34 : vector<1x128xf32>
    %36 = vector.broadcast %26 : f32 to vector<1x128xf32>
    %37 = arith.mulf %36, %35 : vector<1x128xf32>
    %38 = arith.addf %22, %37 : vector<1x128xf32>
    %c2_7 = arith.constant 2 : index
    %39 = memref.load %arg1[%c2_7] : memref<66xf32, #tpu.memory_space<smem>>
    %c10 = arith.constant 10 : index
    %40 = memref.load %arg1[%c10] : memref<66xf32, #tpu.memory_space<smem>>
    %c18 = arith.constant 18 : index
    %41 = memref.load %arg1[%c18] : memref<66xf32, #tpu.memory_space<smem>>
    %c26 = arith.constant 26 : index
    %42 = memref.load %arg1[%c26] : memref<66xf32, #tpu.memory_space<smem>>
    %43 = vector.broadcast %39 : f32 to vector<1x128xf32>
    %44 = arith.mulf %43, %0 : vector<1x128xf32>
    %45 = vector.broadcast %40 : f32 to vector<1x128xf32>
    %46 = arith.mulf %45, %1 : vector<1x128xf32>
    %47 = arith.addf %44, %46 : vector<1x128xf32>
    %48 = vector.broadcast %41 : f32 to vector<1x128xf32>
    %49 = arith.addf %47, %48 : vector<1x128xf32>
    %cst_8 = arith.constant 0.000000e+00 : f32
    %50 = vector.broadcast %cst_8 : f32 to vector<1x128xf32>
    %51 = arith.maximumf %49, %50 : vector<1x128xf32>
    %52 = vector.broadcast %42 : f32 to vector<1x128xf32>
    %53 = arith.mulf %52, %51 : vector<1x128xf32>
    %54 = arith.addf %38, %53 : vector<1x128xf32>
    %c3 = arith.constant 3 : index
    %55 = memref.load %arg1[%c3] : memref<66xf32, #tpu.memory_space<smem>>
    %c11 = arith.constant 11 : index
    %56 = memref.load %arg1[%c11] : memref<66xf32, #tpu.memory_space<smem>>
    %c19 = arith.constant 19 : index
    %57 = memref.load %arg1[%c19] : memref<66xf32, #tpu.memory_space<smem>>
    %c27 = arith.constant 27 : index
    %58 = memref.load %arg1[%c27] : memref<66xf32, #tpu.memory_space<smem>>
    %59 = vector.broadcast %55 : f32 to vector<1x128xf32>
    %60 = arith.mulf %59, %0 : vector<1x128xf32>
    %61 = vector.broadcast %56 : f32 to vector<1x128xf32>
    %62 = arith.mulf %61, %1 : vector<1x128xf32>
    %63 = arith.addf %60, %62 : vector<1x128xf32>
    %64 = vector.broadcast %57 : f32 to vector<1x128xf32>
    %65 = arith.addf %63, %64 : vector<1x128xf32>
    %cst_9 = arith.constant 0.000000e+00 : f32
    %66 = vector.broadcast %cst_9 : f32 to vector<1x128xf32>
    %67 = arith.maximumf %65, %66 : vector<1x128xf32>
    %68 = vector.broadcast %58 : f32 to vector<1x128xf32>
    %69 = arith.mulf %68, %67 : vector<1x128xf32>
    %70 = arith.addf %54, %69 : vector<1x128xf32>
    %c4 = arith.constant 4 : index
    %71 = memref.load %arg1[%c4] : memref<66xf32, #tpu.memory_space<smem>>
    %c12 = arith.constant 12 : index
    %72 = memref.load %arg1[%c12] : memref<66xf32, #tpu.memory_space<smem>>
    %c20 = arith.constant 20 : index
    %73 = memref.load %arg1[%c20] : memref<66xf32, #tpu.memory_space<smem>>
    %c28 = arith.constant 28 : index
    %74 = memref.load %arg1[%c28] : memref<66xf32, #tpu.memory_space<smem>>
    %75 = vector.broadcast %71 : f32 to vector<1x128xf32>
    %76 = arith.mulf %75, %0 : vector<1x128xf32>
    %77 = vector.broadcast %72 : f32 to vector<1x128xf32>
    %78 = arith.mulf %77, %1 : vector<1x128xf32>
    %79 = arith.addf %76, %78 : vector<1x128xf32>
    %80 = vector.broadcast %73 : f32 to vector<1x128xf32>
    %81 = arith.addf %79, %80 : vector<1x128xf32>
    %cst_10 = arith.constant 0.000000e+00 : f32
    %82 = vector.broadcast %cst_10 : f32 to vector<1x128xf32>
    %83 = arith.maximumf %81, %82 : vector<1x128xf32>
    %84 = vector.broadcast %74 : f32 to vector<1x128xf32>
    %85 = arith.mulf %84, %83 : vector<1x128xf32>
    %86 = arith.addf %70, %85 : vector<1x128xf32>
    %c5 = arith.constant 5 : index
    %87 = memref.load %arg1[%c5] : memref<66xf32, #tpu.memory_space<smem>>
    %c13 = arith.constant 13 : index
    %88 = memref.load %arg1[%c13] : memref<66xf32, #tpu.memory_space<smem>>
    %c21 = arith.constant 21 : index
    %89 = memref.load %arg1[%c21] : memref<66xf32, #tpu.memory_space<smem>>
    %c29 = arith.constant 29 : index
    %90 = memref.load %arg1[%c29] : memref<66xf32, #tpu.memory_space<smem>>
    %91 = vector.broadcast %87 : f32 to vector<1x128xf32>
    %92 = arith.mulf %91, %0 : vector<1x128xf32>
    %93 = vector.broadcast %88 : f32 to vector<1x128xf32>
    %94 = arith.mulf %93, %1 : vector<1x128xf32>
    %95 = arith.addf %92, %94 : vector<1x128xf32>
    %96 = vector.broadcast %89 : f32 to vector<1x128xf32>
    %97 = arith.addf %95, %96 : vector<1x128xf32>
    %cst_11 = arith.constant 0.000000e+00 : f32
    %98 = vector.broadcast %cst_11 : f32 to vector<1x128xf32>
    %99 = arith.maximumf %97, %98 : vector<1x128xf32>
    %100 = vector.broadcast %90 : f32 to vector<1x128xf32>
    %101 = arith.mulf %100, %99 : vector<1x128xf32>
    %102 = arith.addf %86, %101 : vector<1x128xf32>
    %c6 = arith.constant 6 : index
    %103 = memref.load %arg1[%c6] : memref<66xf32, #tpu.memory_space<smem>>
    %c14 = arith.constant 14 : index
    %104 = memref.load %arg1[%c14] : memref<66xf32, #tpu.memory_space<smem>>
    %c22 = arith.constant 22 : index
    %105 = memref.load %arg1[%c22] : memref<66xf32, #tpu.memory_space<smem>>
    %c30 = arith.constant 30 : index
    %106 = memref.load %arg1[%c30] : memref<66xf32, #tpu.memory_space<smem>>
    %107 = vector.broadcast %103 : f32 to vector<1x128xf32>
    %108 = arith.mulf %107, %0 : vector<1x128xf32>
    %109 = vector.broadcast %104 : f32 to vector<1x128xf32>
    %110 = arith.mulf %109, %1 : vector<1x128xf32>
    %111 = arith.addf %108, %110 : vector<1x128xf32>
    %112 = vector.broadcast %105 : f32 to vector<1x128xf32>
    %113 = arith.addf %111, %112 : vector<1x128xf32>
    %cst_12 = arith.constant 0.000000e+00 : f32
    %114 = vector.broadcast %cst_12 : f32 to vector<1x128xf32>
    %115 = arith.maximumf %113, %114 : vector<1x128xf32>
    %116 = vector.broadcast %106 : f32 to vector<1x128xf32>
    %117 = arith.mulf %116, %115 : vector<1x128xf32>
    %118 = arith.addf %102, %117 : vector<1x128xf32>
    %c7 = arith.constant 7 : index
    %119 = memref.load %arg1[%c7] : memref<66xf32, #tpu.memory_space<smem>>
    %c15 = arith.constant 15 : index
    %120 = memref.load %arg1[%c15] : memref<66xf32, #tpu.memory_space<smem>>
    %c23 = arith.constant 23 : index
    %121 = memref.load %arg1[%c23] : memref<66xf32, #tpu.memory_space<smem>>
    %c31 = arith.constant 31 : index
    %122 = memref.load %arg1[%c31] : memref<66xf32, #tpu.memory_space<smem>>
    %123 = vector.broadcast %119 : f32 to vector<1x128xf32>
    %124 = arith.mulf %123, %0 : vector<1x128xf32>
    %125 = vector.broadcast %120 : f32 to vector<1x128xf32>
    %126 = arith.mulf %125, %1 : vector<1x128xf32>
    %127 = arith.addf %124, %126 : vector<1x128xf32>
    %128 = vector.broadcast %121 : f32 to vector<1x128xf32>
    %129 = arith.addf %127, %128 : vector<1x128xf32>
    %cst_13 = arith.constant 0.000000e+00 : f32
    %130 = vector.broadcast %cst_13 : f32 to vector<1x128xf32>
    %131 = arith.maximumf %129, %130 : vector<1x128xf32>
    %132 = vector.broadcast %122 : f32 to vector<1x128xf32>
    %133 = arith.mulf %132, %131 : vector<1x128xf32>
    %134 = arith.addf %118, %133 : vector<1x128xf32>
    %135 = math.tanh %134 : vector<1x128xf32>
    %cst_14 = arith.constant 0.000000e+00 : f32
    %136 = vector.broadcast %cst_14 : f32 to vector<1x128xf32>
    %c65 = arith.constant 65 : index
    %137 = memref.load %arg1[%c65] : memref<66xf32, #tpu.memory_space<smem>>
    %138 = vector.broadcast %137 : f32 to vector<1x128xf32>
    %139 = arith.addf %136, %138 : vector<1x128xf32>
    %c33 = arith.constant 33 : index
    %140 = memref.load %arg1[%c33] : memref<66xf32, #tpu.memory_space<smem>>
    %c41 = arith.constant 41 : index
    %141 = memref.load %arg1[%c41] : memref<66xf32, #tpu.memory_space<smem>>
    %c49 = arith.constant 49 : index
    %142 = memref.load %arg1[%c49] : memref<66xf32, #tpu.memory_space<smem>>
    %c57 = arith.constant 57 : index
    %143 = memref.load %arg1[%c57] : memref<66xf32, #tpu.memory_space<smem>>
    %144 = vector.broadcast %140 : f32 to vector<1x128xf32>
    %145 = arith.mulf %144, %0 : vector<1x128xf32>
    %146 = vector.broadcast %141 : f32 to vector<1x128xf32>
    %147 = arith.mulf %146, %1 : vector<1x128xf32>
    %148 = arith.addf %145, %147 : vector<1x128xf32>
    %149 = vector.broadcast %142 : f32 to vector<1x128xf32>
    %150 = arith.addf %148, %149 : vector<1x128xf32>
    %cst_15 = arith.constant 0.000000e+00 : f32
    %151 = vector.broadcast %cst_15 : f32 to vector<1x128xf32>
    %152 = arith.maximumf %150, %151 : vector<1x128xf32>
    %153 = vector.broadcast %143 : f32 to vector<1x128xf32>
    %154 = arith.mulf %153, %152 : vector<1x128xf32>
    %155 = arith.addf %139, %154 : vector<1x128xf32>
    %c34 = arith.constant 34 : index
    %156 = memref.load %arg1[%c34] : memref<66xf32, #tpu.memory_space<smem>>
    %c42 = arith.constant 42 : index
    %157 = memref.load %arg1[%c42] : memref<66xf32, #tpu.memory_space<smem>>
    %c50 = arith.constant 50 : index
    %158 = memref.load %arg1[%c50] : memref<66xf32, #tpu.memory_space<smem>>
    %c58 = arith.constant 58 : index
    %159 = memref.load %arg1[%c58] : memref<66xf32, #tpu.memory_space<smem>>
    %160 = vector.broadcast %156 : f32 to vector<1x128xf32>
    %161 = arith.mulf %160, %0 : vector<1x128xf32>
    %162 = vector.broadcast %157 : f32 to vector<1x128xf32>
    %163 = arith.mulf %162, %1 : vector<1x128xf32>
    %164 = arith.addf %161, %163 : vector<1x128xf32>
    %165 = vector.broadcast %158 : f32 to vector<1x128xf32>
    %166 = arith.addf %164, %165 : vector<1x128xf32>
    %cst_16 = arith.constant 0.000000e+00 : f32
    %167 = vector.broadcast %cst_16 : f32 to vector<1x128xf32>
    %168 = arith.maximumf %166, %167 : vector<1x128xf32>
    %169 = vector.broadcast %159 : f32 to vector<1x128xf32>
    %170 = arith.mulf %169, %168 : vector<1x128xf32>
    %171 = arith.addf %155, %170 : vector<1x128xf32>
    %c35 = arith.constant 35 : index
    %172 = memref.load %arg1[%c35] : memref<66xf32, #tpu.memory_space<smem>>
    %c43 = arith.constant 43 : index
    %173 = memref.load %arg1[%c43] : memref<66xf32, #tpu.memory_space<smem>>
    %c51 = arith.constant 51 : index
    %174 = memref.load %arg1[%c51] : memref<66xf32, #tpu.memory_space<smem>>
    %c59 = arith.constant 59 : index
    %175 = memref.load %arg1[%c59] : memref<66xf32, #tpu.memory_space<smem>>
    %176 = vector.broadcast %172 : f32 to vector<1x128xf32>
    %177 = arith.mulf %176, %0 : vector<1x128xf32>
    %178 = vector.broadcast %173 : f32 to vector<1x128xf32>
    %179 = arith.mulf %178, %1 : vector<1x128xf32>
    %180 = arith.addf %177, %179 : vector<1x128xf32>
    %181 = vector.broadcast %174 : f32 to vector<1x128xf32>
    %182 = arith.addf %180, %181 : vector<1x128xf32>
    %cst_17 = arith.constant 0.000000e+00 : f32
    %183 = vector.broadcast %cst_17 : f32 to vector<1x128xf32>
    %184 = arith.maximumf %182, %183 : vector<1x128xf32>
    %185 = vector.broadcast %175 : f32 to vector<1x128xf32>
    %186 = arith.mulf %185, %184 : vector<1x128xf32>
    %187 = arith.addf %171, %186 : vector<1x128xf32>
    %c36 = arith.constant 36 : index
    %188 = memref.load %arg1[%c36] : memref<66xf32, #tpu.memory_space<smem>>
    %c44 = arith.constant 44 : index
    %189 = memref.load %arg1[%c44] : memref<66xf32, #tpu.memory_space<smem>>
    %c52 = arith.constant 52 : index
    %190 = memref.load %arg1[%c52] : memref<66xf32, #tpu.memory_space<smem>>
    %c60 = arith.constant 60 : index
    %191 = memref.load %arg1[%c60] : memref<66xf32, #tpu.memory_space<smem>>
    %192 = vector.broadcast %188 : f32 to vector<1x128xf32>
    %193 = arith.mulf %192, %0 : vector<1x128xf32>
    %194 = vector.broadcast %189 : f32 to vector<1x128xf32>
    %195 = arith.mulf %194, %1 : vector<1x128xf32>
    %196 = arith.addf %193, %195 : vector<1x128xf32>
    %197 = vector.broadcast %190 : f32 to vector<1x128xf32>
    %198 = arith.addf %196, %197 : vector<1x128xf32>
    %cst_18 = arith.constant 0.000000e+00 : f32
    %199 = vector.broadcast %cst_18 : f32 to vector<1x128xf32>
    %200 = arith.maximumf %198, %199 : vector<1x128xf32>
    %201 = vector.broadcast %191 : f32 to vector<1x128xf32>
    %202 = arith.mulf %201, %200 : vector<1x128xf32>
    %203 = arith.addf %187, %202 : vector<1x128xf32>
    %c37 = arith.constant 37 : index
    %204 = memref.load %arg1[%c37] : memref<66xf32, #tpu.memory_space<smem>>
    %c45 = arith.constant 45 : index
    %205 = memref.load %arg1[%c45] : memref<66xf32, #tpu.memory_space<smem>>
    %c53 = arith.constant 53 : index
    %206 = memref.load %arg1[%c53] : memref<66xf32, #tpu.memory_space<smem>>
    %c61 = arith.constant 61 : index
    %207 = memref.load %arg1[%c61] : memref<66xf32, #tpu.memory_space<smem>>
    %208 = vector.broadcast %204 : f32 to vector<1x128xf32>
    %209 = arith.mulf %208, %0 : vector<1x128xf32>
    %210 = vector.broadcast %205 : f32 to vector<1x128xf32>
    %211 = arith.mulf %210, %1 : vector<1x128xf32>
    %212 = arith.addf %209, %211 : vector<1x128xf32>
    %213 = vector.broadcast %206 : f32 to vector<1x128xf32>
    %214 = arith.addf %212, %213 : vector<1x128xf32>
    %cst_19 = arith.constant 0.000000e+00 : f32
    %215 = vector.broadcast %cst_19 : f32 to vector<1x128xf32>
    %216 = arith.maximumf %214, %215 : vector<1x128xf32>
    %217 = vector.broadcast %207 : f32 to vector<1x128xf32>
    %218 = arith.mulf %217, %216 : vector<1x128xf32>
    %219 = arith.addf %203, %218 : vector<1x128xf32>
    %c38 = arith.constant 38 : index
    %220 = memref.load %arg1[%c38] : memref<66xf32, #tpu.memory_space<smem>>
    %c46 = arith.constant 46 : index
    %221 = memref.load %arg1[%c46] : memref<66xf32, #tpu.memory_space<smem>>
    %c54 = arith.constant 54 : index
    %222 = memref.load %arg1[%c54] : memref<66xf32, #tpu.memory_space<smem>>
    %c62 = arith.constant 62 : index
    %223 = memref.load %arg1[%c62] : memref<66xf32, #tpu.memory_space<smem>>
    %224 = vector.broadcast %220 : f32 to vector<1x128xf32>
    %225 = arith.mulf %224, %0 : vector<1x128xf32>
    %226 = vector.broadcast %221 : f32 to vector<1x128xf32>
    %227 = arith.mulf %226, %1 : vector<1x128xf32>
    %228 = arith.addf %225, %227 : vector<1x128xf32>
    %229 = vector.broadcast %222 : f32 to vector<1x128xf32>
    %230 = arith.addf %228, %229 : vector<1x128xf32>
    %cst_20 = arith.constant 0.000000e+00 : f32
    %231 = vector.broadcast %cst_20 : f32 to vector<1x128xf32>
    %232 = arith.maximumf %230, %231 : vector<1x128xf32>
    %233 = vector.broadcast %223 : f32 to vector<1x128xf32>
    %234 = arith.mulf %233, %232 : vector<1x128xf32>
    %235 = arith.addf %219, %234 : vector<1x128xf32>
    %c39 = arith.constant 39 : index
    %236 = memref.load %arg1[%c39] : memref<66xf32, #tpu.memory_space<smem>>
    %c47 = arith.constant 47 : index
    %237 = memref.load %arg1[%c47] : memref<66xf32, #tpu.memory_space<smem>>
    %c55 = arith.constant 55 : index
    %238 = memref.load %arg1[%c55] : memref<66xf32, #tpu.memory_space<smem>>
    %c63 = arith.constant 63 : index
    %239 = memref.load %arg1[%c63] : memref<66xf32, #tpu.memory_space<smem>>
    %240 = vector.broadcast %236 : f32 to vector<1x128xf32>
    %241 = arith.mulf %240, %0 : vector<1x128xf32>
    %242 = vector.broadcast %237 : f32 to vector<1x128xf32>
    %243 = arith.mulf %242, %1 : vector<1x128xf32>
    %244 = arith.addf %241, %243 : vector<1x128xf32>
    %245 = vector.broadcast %238 : f32 to vector<1x128xf32>
    %246 = arith.addf %244, %245 : vector<1x128xf32>
    %cst_21 = arith.constant 0.000000e+00 : f32
    %247 = vector.broadcast %cst_21 : f32 to vector<1x128xf32>
    %248 = arith.maximumf %246, %247 : vector<1x128xf32>
    %249 = vector.broadcast %239 : f32 to vector<1x128xf32>
    %250 = arith.mulf %249, %248 : vector<1x128xf32>
    %251 = arith.addf %235, %250 : vector<1x128xf32>
    %c40 = arith.constant 40 : index
    %252 = memref.load %arg1[%c40] : memref<66xf32, #tpu.memory_space<smem>>
    %c48 = arith.constant 48 : index
    %253 = memref.load %arg1[%c48] : memref<66xf32, #tpu.memory_space<smem>>
    %c56 = arith.constant 56 : index
    %254 = memref.load %arg1[%c56] : memref<66xf32, #tpu.memory_space<smem>>
    %c64 = arith.constant 64 : index
    %255 = memref.load %arg1[%c64] : memref<66xf32, #tpu.memory_space<smem>>
    %256 = vector.broadcast %252 : f32 to vector<1x128xf32>
    %257 = arith.mulf %256, %0 : vector<1x128xf32>
    %258 = vector.broadcast %253 : f32 to vector<1x128xf32>
    %259 = arith.mulf %258, %1 : vector<1x128xf32>
    %260 = arith.addf %257, %259 : vector<1x128xf32>
    %261 = vector.broadcast %254 : f32 to vector<1x128xf32>
    %262 = arith.addf %260, %261 : vector<1x128xf32>
    %cst_22 = arith.constant 0.000000e+00 : f32
    %263 = vector.broadcast %cst_22 : f32 to vector<1x128xf32>
    %264 = arith.maximumf %262, %263 : vector<1x128xf32>
    %265 = vector.broadcast %255 : f32 to vector<1x128xf32>
    %266 = arith.mulf %265, %264 : vector<1x128xf32>
    %267 = arith.addf %251, %266 : vector<1x128xf32>
    %268 = math.tanh %267 : vector<1x128xf32>
    %cst_23 = arith.constant 4.000000e+00 : f32
    %269 = vector.broadcast %cst_23 : f32 to vector<1x128xf32>
    %270 = arith.cmpf oeq, %2, %269 : vector<1x128xf32>
    %271 = arith.select %270, %135, %268 : vector<1x128xi1>, vector<1x128xf32>
    %c0_24 = arith.constant 0 : index
    %c0_25 = arith.constant 0 : index
    %272 = vector.load %arg3[%c0_24, %c0_25] : memref<1x128xf32, #tpu.memory_space<vmem>>, vector<1x128xf32>
    tpu.vector_store %arg3[%c0_24, %c0_25], %271 {strides = array<i32>} : memref<1x128xf32, #tpu.memory_space<vmem>>, vector<1x128xf32>,
    return
  }
  func.func @transform_0(%arg0: i32) -> i32 {
    %c0_i32 = arith.constant 0 : i32
    %c0_i32_0 = arith.constant 0 : i32
    return %c0_i32 : i32
  }
  func.func @transform_1(%arg0: i32) -> (i32, i32) {
    %c0_i32 = arith.constant 0 : i32
    %c0_i32_0 = arith.constant 0 : i32
    return %c0_i32, %arg0 : i32, i32
  }
  func.func @transform_2(%arg0: i32) -> (i32, i32) {
    %c0_i32 = arith.constant 0 : i32
    %c0_i32_0 = arith.constant 0 : i32
    return %c0_i32, %arg0 : i32, i32
  }
}

</mosaic_0001>

<bundles_post_ra>
// kernel: two_heads_forward.1
= control target key start
LH: loop header
LB: loop body
LE: loop exit
PB: predicated region body
PF: predicated region fallthrough
CT: control target
= control target key end

     0   :  { %7 = vsyncpa [#allocation3], 0  ;;  %s367_s12 = smov [#allocation2]   ;;  %s600_s0 = inlined_call_operand.vmem [shape: f32[66], index: 0, kind: input, shape index: {}]   ;;  %s601_s1 = inlined_call_operand.vmem [shape: f32[3,128], index: 1, kind: input, shape index: {}]   ;;  %s602_s2 = inlined_call_operand.vmem [shape: f32[1,128], index: 2, kind: output, shape index: {}]  }
   0x1   :  { %s13_s11 = sshll.u32 %s600_s0, 4  ;;  %s14_s11 = int_to_ptr.vmem [resolvable:$true] %s13_s11 }
   0x2   :  { %16 = dma.vmem_to_smem %s14_s11, 16, %s367_s12, [#allocation3]  }
   0x3   :  { %365 = dma.done.wait [#allocation3], 16  }
   0x4   :  { %366 = vsyncadd [#allocation3], 4294967280 }
   0x5   :  { %23 = sfence }
   0x6   :  { %s386_s13 = sld [smem:[#allocation2 + $0x20]]  ;;  %v399_v0 = vld [vmem:[%s601_s1] sm:$0x1]  ;;  %v404_v1 = vld [vmem:[%s601_s1 + $0x1] sm:$0x1] }
   0x7   :  { %s30_s14 = sld [smem:[#allocation2]] }
   0x8   :  { %s284_s15 = sld [smem:[#allocation2 + $0x8]] }
   0x9   :  { %s388_s16 = sld [smem:[#allocation2 + $0x10]] }
   0xa   :  { %s390_s17 = sld [smem:[#allocation2 + $0x18]] }
   0xb   :  { %s287_s18 = sld [smem:[#allocation2 + $0x1]] }
   0xc   :  { %s288_s19 = sld [smem:[#allocation2 + $0x9]]  ;;  %v28_v32 = vstv %s386_s13 }
   0xd   :  { %s392_s20 = sld [smem:[#allocation2 + $0x11]]  ;;  %v34_v2 = vstv %s30_s14 }
   0xe   :  { %s394_s21 = sld [smem:[#allocation2 + $0x19]]  ;;  %v36_v3 = vstv %s284_s15  ;;  %v35_v4 = vmul.f32 %v34_v2, %v399_v0 }
   0xf   :  { %s291_s0 = sld [smem:[#allocation2 + $0x2]]  ;;  %v37_v5 = vmul.f32 %v36_v3, %v404_v1  ;;  %v39_v9 = vstv %s388_s16 }
  0x10   :  { %s292_s26 = sld [smem:[#allocation2 + $0xa]]  ;;  %v42_v26 = vstv %s390_s17 }
  0x11   :  { %s406_s27 = sld [smem:[#allocation2 + $0x12]]  ;;  %v49_v6 = vstv %s287_s18  ;;  %v38_v8 = vadd.f32 %v37_v5, %v35_v4 }
  0x12   :  { %s408_s28 = sld [smem:[#allocation2 + $0x1a]]  ;;  %v51_v7 = vstv %s288_s19  ;;  %v50_v10 = vmul.f32 %v49_v6, %v399_v0 }
  0x13   :  { %s412_s29 = sld [smem:[#allocation2 + $0x3]]  ;;  %v52_v11 = vmul.f32 %v51_v7, %v404_v1  ;;  %v40_v14 = vadd.f32 %v39_v9, %v38_v8  ;;  %v54_v18 = vstv %s392_s20 }
  0x14   :  { %s414_s30 = sld [smem:[#allocation2 + $0xb]]  ;;  %v57_v33 = vstv %s394_s21 }
  0x15   :  { %s416_s3 = sld [smem:[#allocation2 + $0x13]]  ;;  %v64_v12 = vstv %s291_s0  ;;  %v53_v15 = vadd.f32 %v52_v11, %v50_v10  ;;  %v41_v21 = vmax.f32 %v40_v14, 0.0 }
  0x16   :  { %s418_s4 = sld [smem:[#allocation2 + $0x1b]]  ;;  %v66_v13 = vstv %s292_s26  ;;  %v65_v16 = vmul.f32 %v64_v12, %v399_v0 }
  0x17   :  { %s420_s5 = sld [smem:[#allocation2 + $0x4]]  ;;  %v67_v17 = vmul.f32 %v66_v13, %v404_v1  ;;  %v55_v22 = vadd.f32 %v54_v18, %v53_v15  ;;  %v69_v27 = vstv %s406_s27  ;;  %v43_v28 = vmul.f32 %v42_v26, %v41_v21 }
  0x18   :  { %s425_s6 = sld [smem:[#allocation2 + $0xc]]  ;;  %v72_v41 = vstv %s408_s28 }
  0x19   :  { %s427_s7 = sld [smem:[#allocation2 + $0x14]]  ;;  %v79_v19 = vstv %s412_s29  ;;  %v68_v23 = vadd.f32 %v67_v17, %v65_v16  ;;  %v56_v29 = vmax.f32 %v55_v22, 0.0  ;;  %v44_v37 = vadd.f32 %v43_v28, %v28_v32 }
  0x1a   :  { %s429_s8 = sld [smem:[#allocation2 + $0x1c]]  ;;  %v81_v20 = vstv %s414_s30  ;;  %v80_v24 = vmul.f32 %v79_v19, %v399_v0 }
  0x1b   :  { %s431_s9 = sld [smem:[#allocation2 + $0x5]]  ;;  %v82_v25 = vmul.f32 %v81_v20, %v404_v1  ;;  %v70_v30 = vadd.f32 %v69_v27, %v68_v23  ;;  %v84_v34 = vstv %s416_s3  ;;  %v58_v38 = vmul.f32 %v57_v33, %v56_v29 }
  0x1c   :  { %s435_s10 = sld [smem:[#allocation2 + $0xd]]  ;;  %v87_v47 = vstv %s418_s4 }
  0x1d   :  { %s440_s11 = sld [smem:[#allocation2 + $0x15]]  ;;  %v83_v31 = vadd.f32 %v82_v25, %v80_v24  ;;  %v94_v35 = vstv %s420_s5  ;;  %v71_v39 = vmax.f32 %v70_v30, 0.0  ;;  %v59_v44 = vadd.f32 %v58_v38, %v44_v37 }
  0x1e   :  { %s442_s12 = sld [smem:[#allocation2 + $0x1d]]  ;;  %v96_v36 = vstv %s425_s6  ;;  %v95_v42 = vmul.f32 %v94_v35, %v399_v0 }
  0x1f   :  { %s444_s14 = sld [smem:[#allocation2 + $0x6]]  ;;  %v85_v40 = vadd.f32 %v84_v34, %v83_v31  ;;  %v97_v43 = vmul.f32 %v96_v36, %v404_v1  ;;  %v73_v45 = vmul.f32 %v72_v41, %v71_v39  ;;  %v99_v49 = vstv %s427_s7 }
  0x20   :  { %s448_s15 = sld [smem:[#allocation2 + $0xe]]  ;;  %v102_v59 = vstv %s429_s8 }
  0x21   :  { %s452_s16 = sld [smem:[#allocation2 + $0x16]]  ;;  %v86_v46 = vmax.f32 %v85_v40, 0.0  ;;  %v98_v48 = vadd.f32 %v97_v43, %v95_v42  ;;  %v109_v51 = vstv %s431_s9  ;;  %v74_v55 = vadd.f32 %v73_v45, %v59_v44 }
  0x22   :  { %s454_s18 = sld [smem:[#allocation2 + $0x1e]]  ;;  %v111_v52 = vstv %s435_s10  ;;  %v110_v61 = vmul.f32 %v109_v51, %v399_v0 }
  0x23   :  { %s456_s19 = sld [smem:[#allocation2 + $0x7]]  ;;  %v88_v56 = vmul.f32 %v87_v47, %v86_v46  ;;  %v490_v58 = vadd.f32 %v99_v49, %v98_v48  ;;  %v112_v62 = vmul.f32 %v111_v52, %v404_v1  ;;  %v114_v3 = vstv %s440_s11 }
  0x24   :  { %s458_s20 = sld [smem:[#allocation2 + $0xf]]  ;;  %v117_v4 = vstv %s442_s12 }
  0x25   :  { %s463_s0 = sld [smem:[#allocation2 + $0x17]]  ;;  %v505_v7 = vadd.f32 %v88_v56, %v74_v55  ;;  %v124_v8 = vstv %s444_s14  ;;  %v101_v11 = vmax.f32 %v490_v58, 0.0  ;;  %v113_v15 = vadd.f32 %v112_v62, %v110_v61 }
  0x26   :  { %s467_s17 = sld [smem:[#allocation2 + $0x1f]]  ;;  %v126_v12 = vstv %s448_s15  ;;  %v125_v19 = vmul.f32 %v124_v8, %v399_v0 }
  0x27   :  { %s469_s22 = sld [smem:[#allocation2 + $0x41]]  ;;  %v127_v23 = vmul.f32 %v126_v12, %v404_v1  ;;  %v115_v35 = vadd.f32 %v114_v3, %v113_v15  ;;  %v129_v36 = vstv %s452_s16  ;;  %v103_v51 = vmul.f32 %v102_v59, %v101_v11 }
  0x28   :  { %s316_s23 = sld [smem:[#allocation2 + $0x21]]  ;;  %v132_v8 = vstv %s454_s18 }
  0x29   :  { %s317_s13 = sld [smem:[#allocation2 + $0x29]]  ;;  %v139_v27 = vstv %s456_s19  ;;  %v128_v39 = vadd.f32 %v127_v23, %v125_v19  ;;  %v116_v52 = vmax.f32 %v115_v35, 0.0 }
  0x2a   :  { %s474_s21 = sld [smem:[#allocation2 + $0x31]]  ;;  %v141_v28 = vstv %s458_s20  ;;  %v140_v43 = vmul.f32 %v139_v27, %v399_v0 }
  0x2b   :  { %s476_s24 = sld [smem:[#allocation2 + $0x39]]  ;;  %v142_v44 = vmul.f32 %v141_v28, %v404_v1  ;;  %v130_v55 = vadd.f32 %v129_v36, %v128_v39  ;;  %v144_v61 = vstv %s463_s0  ;;  %v118_v11 = vmul.f32 %v117_v4, %v116_v52 }
  0x2c   :  { %s320_s25 = sld [smem:[#allocation2 + $0x22]]  ;;  %v147_v35 = vstv %s467_s17 }
  0x2d   :  { %s321_s26 = sld [smem:[#allocation2 + $0x2a]]  ;;  %v152_v20 = vstv %s469_s22  ;;  %v131_v15 = vmax.f32 %v130_v55, 0.0 }
  0x2e   :  { %v158_v50 = vstv %s316_s23  ;;  %s480_s27 = sld [smem:[#allocation2 + $0x32]] }
  0x2f   :  { %v159_v53 = vmul.f32 %v158_v50, %v399_v0  ;;  %v160_v54 = vstv %s317_s13  ;;  %s485_s28 = sld [smem:[#allocation2 + $0x3a]]  ;;  %v133_v27 = vmul.f32 %v132_v8, %v131_v15 }
  0x30   :  { %v161_v57 = vmul.f32 %v160_v54, %v404_v1  ;;  %s488_s29 = sld [smem:[#allocation2 + $0x23]]  ;;  %v163_v60 = vstv %s474_s21 }
  0x31   :  { %s494_s30 = sld [smem:[#allocation2 + $0x2b]]  ;;  %v166_v13 = vstv %s476_s24 }
  0x32   :  { %v162_v63 = vadd.f32 %v161_v57, %v159_v53  ;;  %v173_v2 = vstv %s320_s25  ;;  %s498_s3 = sld [smem:[#allocation2 + $0x33]] }
  0x33   :  { %v174_v5 = vmul.f32 %v173_v2, %v399_v0  ;;  %v175_v6 = vstv %s321_s26  ;;  %s503_s4 = sld [smem:[#allocation2 + $0x3b]] }
  0x34   :  { %v164_v9 = vadd.f32 %v163_v60, %v162_v63  ;;  %v176_v10 = vmul.f32 %v175_v6, %v404_v1  ;;  %s509_s5 = sld [smem:[#allocation2 + $0x24]]  ;;  %v178_v14 = vstv %s480_s27  ;;  %v143_v60 = vadd.f32 %v142_v44, %v140_v43 }
  0x35   :  { %s515_s6 = sld [smem:[#allocation2 + $0x2c]]  ;;  %v181_v29 = vstv %s485_s28  ;;  %v104_v6 = vadd.f32 %v103_v51, %v505_v7 }
  0x36   :  { %v165_v16 = vmax.f32 %v164_v9, 0.0  ;;  %v177_v17 = vadd.f32 %v176_v10, %v174_v5  ;;  %v188_v18 = vstv %s488_s29  ;;  %s518_s7 = sld [smem:[#allocation2 + $0x34]] }
  0x37   :  { %v189_v21 = vmul.f32 %v188_v18, %v399_v0  ;;  %v190_v22 = vstv %s494_s30  ;;  %s524_s9 = sld [smem:[#allocation2 + $0x3c]]  ;;  %v119_v23 = vadd.f32 %v118_v11, %v104_v6 }
  0x38   :  { %v167_v24 = vmul.f32 %v166_v13, %v165_v16  ;;  %v179_v25 = vadd.f32 %v178_v14, %v177_v17  ;;  %v191_v26 = vmul.f32 %v190_v22, %v404_v1  ;;  %s528_s10 = sld [smem:[#allocation2 + $0x25]]  ;;  %v193_v30 = vstv %s498_s3 }
  0x39   :  { %s534_s11 = sld [smem:[#allocation2 + $0x2d]]  ;;  %v196_v45 = vstv %s503_s4  ;;  %v145_v16 = vadd.f32 %v144_v61, %v143_v60 }
  0x3a   :  { %v168_v31 = vadd.f32 %v167_v24, %v152_v20  ;;  %v180_v32 = vmax.f32 %v179_v25, 0.0  ;;  %v192_v33 = vadd.f32 %v191_v26, %v189_v21  ;;  %v203_v34 = vstv %s509_s5  ;;  %s537_s14 = sld [smem:[#allocation2 + $0x35]] }
  0x3b   :  { %v204_v37 = vmul.f32 %v203_v34, %v399_v0  ;;  %v205_v38 = vstv %s515_s6  ;;  %s542_s15 = sld [smem:[#allocation2 + $0x3d]]  ;;  %v146_v28 = vmax.f32 %v145_v16, 0.0 }
  0x3c   :  { %v182_v40 = vmul.f32 %v181_v29, %v180_v32  ;;  %v194_v41 = vadd.f32 %v193_v30, %v192_v33  ;;  %v206_v42 = vmul.f32 %v205_v38, %v404_v1  ;;  %s545_s19 = sld [smem:[#allocation2 + $0x26]]  ;;  %v208_v46 = vstv %s518_s7 }
  0x3d   :  { %s551_s16 = sld [smem:[#allocation2 + $0x2e]]  ;;  %v211_v59 = vstv %s524_s9  ;;  %v148_v44 = vmul.f32 %v147_v35, %v146_v28 }
  0x3e   :  { %v183_v47 = vadd.f32 %v182_v40, %v168_v31  ;;  %v195_v48 = vmax.f32 %v194_v41, 0.0  ;;  %v207_v49 = vadd.f32 %v206_v42, %v204_v37  ;;  %v218_v50 = vstv %s528_s10  ;;  %s554_s20 = sld [smem:[#allocation2 + $0x36]] }
  0x3f   :  { %v219_v53 = vmul.f32 %v218_v50, %v399_v0  ;;  %v220_v54 = vstv %s534_s11  ;;  %s560_s22 = sld [smem:[#allocation2 + $0x3e]]  ;;  %v134_v41 = vadd.f32 %v133_v27, %v119_v23 }
  0x40   :  { %v197_v56 = vmul.f32 %v196_v45, %v195_v48  ;;  %v209_v57 = vadd.f32 %v208_v46, %v207_v49  ;;  %v221_v58 = vmul.f32 %v220_v54, %v404_v1  ;;  %s563_s23 = sld [smem:[#allocation2 + $0x27]]  ;;  %v223_v62 = vstv %s537_s14 }
  0x41   :  { %s568_s8 = sld [smem:[#allocation2 + $0x2f]]  ;;  %v226_v17 = vstv %s542_s15  ;;  %v149_v51 = vadd.f32 %v148_v44, %v134_v41 }
  0x42   :  { %v198_v63 = vadd.f32 %v197_v56, %v183_v47  ;;  %v210_v2 = vmax.f32 %v209_v57, 0.0  ;;  %v222_v3 = vadd.f32 %v221_v58, %v219_v53  ;;  %v233_v5 = vstv %s545_s19  ;;  %s571_s13 = sld [smem:[#allocation2 + $0x37]] }
  0x43   :  { %v234_v9 = vmul.f32 %v233_v5, %v399_v0  ;;  %v235_v10 = vstv %s551_s16  ;;  %s577_s0 = sld [smem:[#allocation2 + $0x3f]]  ;;  %349 = vtanh.f32 %v149_v51 }
  0x44   :  { %v212_v12 = vmul.f32 %v211_v59, %v210_v2  ;;  %v224_v13 = vadd.f32 %v223_v62, %v222_v3  ;;  %v236_v14 = vmul.f32 %v235_v10, %v404_v1  ;;  %s344_s21 = sld [smem:[#allocation2 + $0x28]]  ;;  %v238_v7 = vstv %s554_s20 }
  0x45   :  { %s345_s18 = sld [smem:[#allocation2 + $0x30]]  ;;  %v241_v29 = vstv %s560_s22 }
  0x46   :  { %v213_v18 = vadd.f32 %v212_v12, %v198_v63  ;;  %v225_v19 = vmax.f32 %v224_v13, 0.0  ;;  %v237_v20 = vadd.f32 %v236_v14, %v234_v9  ;;  %v248_v21 = vstv %s563_s23  ;;  %s346_s24 = sld [smem:[#allocation2 + $0x38]] }
  0x47   :  { %v249_v4 = vmul.f32 %v248_v21, %v399_v0  ;;  %v250_v22 = vstv %s568_s8  ;;  %s347_s12 = sld [smem:[#allocation2 + $0x40]] }
  0x48   :  { %v227_v24 = vmul.f32 %v226_v17, %v225_v19  ;;  %v239_v25 = vadd.f32 %v238_v7, %v237_v20  ;;  %v251_v26 = vmul.f32 %v250_v22, %v404_v1  ;;  %v253_v30 = vstv %s571_s13 }
  0x49   :  { %v256_v42 = vstv %s577_s0  ;;  %v350_v55 = vpop.eup %349 }
  0x4a   :  { %v228_v31 = vadd.f32 %v227_v24, %v213_v18  ;;  %v240_v32 = vmax.f32 %v239_v25, 0.0  ;;  %v252_v33 = vadd.f32 %v251_v26, %v249_v4  ;;  %v263_v34 = vstv %s344_s21 }
  0x4b   :  { %v264_v36 = vmul.f32 %v263_v34, %v399_v0  ;;  %v265_v37 = vstv %s345_s18 }
  0x4c   :  { %v242_v38 = vmul.f32 %v241_v29, %v240_v32  ;;  %v254_v39 = vadd.f32 %v253_v30, %v252_v33  ;;  %v266_v40 = vmul.f32 %v265_v37, %v404_v1  ;;  %v268_v43 = vstv %s346_s24  ;;  %v26_v1 = vld [vmem:[%s601_s1 + $0x2] sm:$0x1] }
  0x4d   :  { %v271_v50 = vstv %s347_s12  ;;  %vm275_vm0 = vcmp.eq.f32.partialorder %v26_v1, 4.0 }
  0x4e   :  { %v243_v45 = vadd.f32 %v242_v38, %v228_v31  ;;  %v255_v46 = vmax.f32 %v254_v39, 0.0  ;;  %v267_v47 = vadd.f32 %v266_v40, %v264_v36 }
  0x50   :  { %v257_v48 = vmul.f32 %v256_v42, %v255_v46  ;;  %v269_v49 = vadd.f32 %v268_v43, %v267_v47 }
  0x52   :  { %v258_v52 = vadd.f32 %v257_v48, %v243_v45  ;;  %v270_v53 = vmax.f32 %v269_v49, 0.0 }
  0x54   :  { %v272_v54 = vmul.f32 %v271_v50, %v270_v53 }
  0x56   :  { %v273_v0 = vadd.f32 %v272_v54, %v258_v52 }
  0x58   :  { %351 = vtanh.f32 %v273_v0 }
  0x5e   :  { %v352_v56 = vpop.eup %351 }
  0x5f   :  { %v276_v57 = vsel %vm275_vm0, %v350_v55, %v352_v56 }
  0x60   :  { %277 = vst [vmem:[%s602_s2] sm:$0x1] %v276_v57 }
  0x61   :  { %282 = vsyncpa [#allocation3], 1 }

</bundles_post_ra>
